<compile_context>
chip_gen: v7x
topology: tpu7x:2x2x1
jax: 0.10.0
libtpu: 0.0.40
codegen_flags: <defaults>
</compile_context>

<pallas_src>
import functools

import jax
import jax.numpy as jnp
from jax.experimental import pallas as pl
from jax.experimental.pallas import tpu as pltpu


def _round_up(x, m):
    return (x + m - 1) // m * m


def _cdiv(a, b):
    return -(-a // b)


def _choose_tile(total, target, step=128):
    """Largest multiple of `step` <= target that divides `total` (total % step == 0)."""
    t = min(target, total)
    t -= t % step
    while t > step and total % t:
        t -= step
    return t if t >= step and total % t == 0 else total


def _vmem_capacity_bytes():
    """Physical per-core VMEM; conservative (v7x-sized) fallback if unknown."""
    try:
        info = pltpu.get_tpu_info()
        for attr in ("vmem_capacity_bytes", "vmem_bytes", "vmem_size_bytes"):
            v = getattr(info, attr, None)
            if v:
                return int(v)
    except Exception:
        pass
    return 64 << 20


def _derive_tiles(H_out, W_pad, KWC_p, Cout_p, KH, halo, B, *,
                  tile_h=None, tile_cout=None, tile_k=None):
    """Generation-aware tile derivation from a VMEM budget."""
    vmem_cap = _vmem_capacity_bytes()
    small_vmem = vmem_cap <= (64 << 20)                    # v7x: 64 MiB / TC
    budget = (44 << 20) if small_vmem else (96 << 20)
    cap = (48 << 20) if small_vmem else (100 << 20)

    TC = _choose_tile(Cout_p, tile_cout if tile_cout else (256 if small_vmem else 512))
    TK = _choose_tile(KWC_p, tile_k if tile_k else (1024 if small_vmem else 2048))
    T_target = tile_h if tile_h else (32 if small_vmem else 64)
    T_max = _round_up(H_out, 8)

    def need(T, TK, nk):
        x_t = (T + halo) * W_pad * TK * 2          # bf16 halo'd activation tile
        w_t = KH * TK * TC * 2                     # bf16 weight slab
        o_t = T * W_pad * TC * 4                   # f32 output tile
        acc = T * W_pad * TC * 4 if nk > 1 else 0  # f32 accumulator scratch
        return 2 * (x_t + w_t + o_t + 2 * TC * 4) + acc

    while True:
        nk = KWC_p // TK
        T = min(_round_up(max(T_target, 8), 8), T_max)
        while T > 8 and need(T, TK, nk) > budget:
            T -= 8
        if need(T, TK, nk) <= budget or TK <= 128:
            break
        TK = _choose_tile(KWC_p, max(128, TK // 2))

    # v7x has 2 TensorCores sharding the "parallel" axes -> keep >= 2 units.
    n_h = _cdiv(H_out, T)
    if B * n_h * (Cout_p // TC) < 2 and H_out > 8:
        T = max(8, _round_up(_cdiv(H_out, 2), 8))

    return T, TC, TK, need(T, TK, KWC_p // TK), cap


def _aspp_kernel_single(x_ref, w_ref, scale_ref, shift_ref, o_ref, *, KH, dilation):
    """Whole contraction in one K tile: no scratch, direct write to o_ref.

    x_ref: (T+halo, W_pad, TK) bf16, w_ref: (KH, TK, TC) bf16,
    scale/shift: (1, TC) f32, o_ref: (T, W_pad, TC).
    """
    T, W_pad, TC = o_ref.shape
    TK = x_ref.shape[-1]
    acc = jnp.dot(x_ref[pl.ds(0, T)].reshape(T * W_pad, TK), w_ref[0],
                  preferred_element_type=jnp.float32)
    for kh in range(1, KH):
        acc += jnp.dot(x_ref[pl.ds(kh * dilation, T)].reshape(T * W_pad, TK),
                       w_ref[kh], preferred_element_type=jnp.float32)
    y = acc * scale_ref[0] + shift_ref[0]                 # fused BN (eval)
    o_ref[...] = jnp.maximum(y, 0.0).reshape(T, W_pad, TC).astype(o_ref.dtype)


def _aspp_kernel_acc(x_ref, w_ref, scale_ref, shift_ref, o_ref, acc_ref, *,
                     KH, dilation):
    """Multi K-tile path: sum KH tap partials, one acc_ref update per K step."""
    T, W_pad, TC = o_ref.shape
    TK = x_ref.shape[-1]
    k = pl.program_id(3)

    partial = jnp.dot(x_ref[pl.ds(0, T)].reshape(T * W_pad, TK), w_ref[0],
                      preferred_element_type=jnp.float32)
    for kh in range(1, KH):
        partial += jnp.dot(x_ref[pl.ds(kh * dilation, T)].reshape(T * W_pad, TK),
                           w_ref[kh], preferred_element_type=jnp.float32)

    @pl.when(k == 0)
    def _init():
        acc_ref[...] = partial

    @pl.when(k > 0)
    def _accum():
        acc_ref[...] += partial

    @pl.when(k == pl.num_programs(3) - 1)
    def _epilogue():
        y = acc_ref[...] * scale_ref[0] + shift_ref[0]    # fused BN (eval)
        o_ref[...] = jnp.maximum(y, 0.0).reshape(T, W_pad, TC).astype(o_ref.dtype)


def aspp_module_forward(x_nchw, weight, bn_gamma, bn_beta, bn_mean, bn_var, *,
                        padding, dilation, eps=1e-5,
                        tile_h=None, tile_cout=None, tile_k=None,
                        out_dtype=jnp.float32):
    """Pallas implementation of _ASPPModule.forward (stride=1, BN eval mode).

    x_nchw : (B, Cin, H, W)        f32 input (PyTorch layout)
    weight : (Cout, Cin, KH, KW)   conv weight (PyTorch layout), bias-free
    bn_*   : (Cout,)               BatchNorm2d params / running stats
    Returns: (B, Cout, H_out, W_out) f32.
    """
    B, Cin, H, W = x_nchw.shape
    Cout, Cin_w, KH, KW = weight.shape
    assert Cin == Cin_w

    d, p = dilation, padding
    Hp, Wp = H + 2 * p, W + 2 * p
    halo = d * (KH - 1)
    H_out = Hp - halo
    W_out = Wp - d * (KW - 1)
    assert H_out > 0 and W_out > 0

    KWC = KW * Cin                              # folded (kw, cin) contraction
    KWC_p = _round_up(KWC, 128)                 # padded once, not per tap
    Cout_p = _round_up(Cout, 128)
    W_pad = _round_up(W_out, 16)                # bf16 sublane-packing aligned

    T, TC, TK, vmem_need, vmem_cap = _derive_tiles(
        H_out, W_pad, KWC_p, Cout_p, KH, halo, B,
        tile_h=tile_h, tile_cout=tile_cout, tile_k=tile_k)

    n_h = _cdiv(H_out, T)
    H_t = n_h * T
    n_c = Cout_p // TC
    n_k = KWC_p // TK

    # ---------------- wrapper glue (layout / padding / im2col / halo) --------
    x = jnp.transpose(x_nchw, (0, 2, 3, 1)).astype(jnp.bfloat16)      # NHWC bf16
    x = jnp.pad(x, ((0, 0), (p, p), (p, p), (0, 0)))                  # (B,Hp,Wp,Cin)
    # Fold KW into the channel dim (im2col over W) -> kernel never slices W.
    x = jnp.concatenate([x[:, :, kw * d: kw * d + W_out, :] for kw in range(KW)],
                        axis=-1)                                      # (B,Hp,W_out,KWC)
    x = jnp.pad(x, ((0, 0), (0, H_t - H_out),
                    (0, W_pad - W_out), (0, KWC_p - KWC)))            # align W / K / H
    # Materialise per-tile halo rows (amortised by large T).
    rows = jnp.arange(n_h)[:, None] * T + jnp.arange(T + halo)[None, :]
    x_tiles = x[:, rows]                            # (B, n_h, T+halo, W_pad, KWC_p)

    wt = jnp.transpose(weight, (2, 3, 1, 0)).reshape(KH, KWC, Cout)   # (KH,KW*Cin,Cout)
    wt = jnp.pad(wt, ((0, 0), (0, KWC_p - KWC),
                      (0, Cout_p - Cout))).astype(jnp.bfloat16)

    scale = (bn_gamma.astype(jnp.float32)
             / jnp.sqrt(bn_var.astype(jnp.float32) + eps))
    shift = bn_beta.astype(jnp.float32) - bn_mean.astype(jnp.float32) * scale
    scale_p = jnp.pad(scale, (0, Cout_p - Cout)).reshape(1, Cout_p)
    shift_p = jnp.pad(shift, (0, Cout_p - Cout)).reshape(1, Cout_p)

    # ---------------- pallas_call ---------------------------------------------
    grid = (B, n_h, n_c, n_k)
    x_spec = pl.BlockSpec((None, None, T + halo, W_pad, TK),
                          lambda b, h, j, k: (b, h, 0, 0, k))
    w_spec = pl.BlockSpec((KH, TK, TC), lambda b, h, j, k: (0, k, j))
    s_spec = pl.BlockSpec((1, TC), lambda b, h, j, k: (0, j))
    o_spec = pl.BlockSpec((None, T, W_pad, TC), lambda b, h, j, k: (b, h, 0, j))

    if n_k == 1:
        kernel = functools.partial(_aspp_kernel_single, KH=KH, dilation=d)
        scratch = []
    else:
        kernel = functools.partial(_aspp_kernel_acc, KH=KH, dilation=d)
        scratch = [pltpu.VMEM((T * W_pad, TC), jnp.float32)]

    vmem_limit = int(min(max(vmem_need + (vmem_need >> 1) + (2 << 20), 16 << 20),
                         vmem_cap))

    out_itemsize = jnp.dtype(out_dtype).itemsize
    flops = 2 * B * H_t * W_pad * KH * KWC_p * Cout_p
    bytes_accessed = (x_tiles.size * 2 * n_c
                      + wt.size * 2 * B * n_h
                      + B * H_t * W_pad * Cout_p * out_itemsize)

    out = pl.pallas_call(
        kernel,
        out_shape=jax.ShapeDtypeStruct((B, H_t, W_pad, Cout_p), out_dtype),
        grid_spec=pltpu.PrefetchScalarGridSpec(
            num_scalar_prefetch=0,
            grid=grid,
            in_specs=[x_spec, w_spec, s_spec, s_spec],
            out_specs=o_spec,
            scratch_shapes=scratch),
        compiler_params=pltpu.CompilerParams(
            dimension_semantics=("parallel", "parallel", "parallel", "arbitrary"),
            vmem_limit_bytes=vmem_limit),
        cost_estimate=pl.CostEstimate(flops=int(flops), transcendentals=0,
                                      bytes_accessed=int(bytes_accessed)),
    )(x_tiles, wt, scale_p, shift_p)

    out = out[:, :H_out, :W_out, :Cout]            # drop row / col / channel pad
    return jnp.transpose(out, (0, 3, 1, 2)).astype(jnp.float32)   # NHWC -> NCHW


def _reference_forward(x_nchw, weight, bn_gamma, bn_beta, bn_mean, bn_var, *,
                       padding, dilation, eps=1e-5):
    """Plain-JAX f32 reference (lax conv) for correctness checking."""
    y = jax.lax.conv_general_dilated(
        x_nchw, weight,
        window_strides=(1, 1),
        padding=((padding, padding), (padding, padding)),
        rhs_dilation=(dilation, dilation),
        dimension_numbers=("NCHW", "OIHW", "NCHW"))
    scale = (bn_gamma / jnp.sqrt(bn_var + eps)).reshape(1, -1, 1, 1)
    shift = (bn_beta - bn_mean * bn_gamma / jnp.sqrt(bn_var + eps)).reshape(1, -1, 1, 1)
    return jnp.maximum(y * scale + shift, 0.0)


def _make_inputs(key, B, Cin, H, W, Cout, K):
    kx, kw, kg, kb, km, kv = jax.random.split(key, 6)
    x = jax.random.normal(kx, (B, Cin, H, W), dtype=jnp.float32)
    # kaiming_normal_ (fan_in, gain sqrt(2)) like the module's _init_weight.
    std = (2.0 / (Cin * K * K)) ** 0.5
    weight = std * jax.random.normal(kw, (Cout, Cin, K, K), dtype=jnp.float32)
    bn_gamma = 1.0 + 0.1 * jax.random.normal(kg, (Cout,), jnp.float32)
    bn_beta = 0.1 * jax.random.normal(kb, (Cout,), jnp.float32)
    bn_mean = 0.1 * jax.random.normal(km, (Cout,), jnp.float32)
    bn_var = 1.0 + 0.1 * jax.random.uniform(kv, (Cout,), jnp.float32)
    return x, weight, bn_gamma, bn_beta, bn_mean, bn_var


def _check(args, *, padding, dilation, **tile_kw):
    x, weight, g, b, m, v = args
    out = aspp_module_forward(x, weight, g, b, m, v,
                              padding=padding, dilation=dilation, **tile_kw)
    out = jax.block_until_ready(out)
    ref = _reference_forward(x, weight, g, b, m, v,
                             padding=padding, dilation=dilation)
    assert out.shape == ref.shape, (out.shape, ref.shape)
    max_err = float(jnp.max(jnp.abs(out - ref)))
    # bf16 activations/weights on the MXU (f32 accumulation) -> loosened tol.
    assert jnp.allclose(out, ref, atol=5e-2, rtol=5e-2), \
        f"mismatch vs reference, max abs err {max_err}"


if __name__ == "__main__":
    key = jax.random.PRNGKey(0)
    k1, k2 = jax.random.split(key)

    # 1) Small ASPP-branch-like config (single K tile, default derived tiles).
    _check(_make_inputs(k1, B=2, Cin=4, H=16, W=16, Cout=8, K=3),
           padding=2, dilation=2)

    # 2) Exercise the multi-K accumulation path and W_out % 16 != 0 padding.
    _check(_make_inputs(k2, B=2, Cin=48, H=16, W=15, Cout=8, K=3),
           padding=2, dilation=2, tile_h=8, tile_k=128)

    print("KERNEL_OK")
</pallas_src>

<mosaic_0001>
module attributes {stable_mosaic.version = 11 : i64} {
  func.func @_aspp_kernel_single(%arg0: i32, %arg1: i32, %arg2: i32, %arg3: i32, %arg4: memref<1x1x20x16x128xbf16, #tpu.memory_space<vmem>>, %arg5: memref<3x128x128xbf16, #tpu.memory_space<vmem>>, %arg6: memref<1x128xf32, #tpu.memory_space<vmem>>, %arg7: memref<1x128xf32, #tpu.memory_space<vmem>>, %arg8: memref<1x16x16x128xf32, #tpu.memory_space<vmem>>) attributes {dimension_semantics = [#tpu.dimension_semantics<parallel>, #tpu.dimension_semantics<parallel>, #tpu.dimension_semantics<parallel>, #tpu.dimension_semantics<arbitrary>], iteration_bounds = array<i64: 2, 1, 1, 1>, scalar_prefetch = 0 : i64, scratch_operands = 0 : i64, tpu.core_type = #tpu.core_type<tc>, window_params = [{transform_indices = @transform_0, window_bounds = array<i64: 1, 1, 20, 16, 128>}, {transform_indices = @transform_1, window_bounds = array<i64: 3, 128, 128>}, {transform_indices = @transform_2, window_bounds = array<i64: 1, 128>}, {transform_indices = @transform_3, window_bounds = array<i64: 1, 128>}, {transform_indices = @transform_4, window_bounds = array<i64: 1, 16, 16, 128>}]} {
    %c0 = arith.constant 0 : index
    %c0_0 = arith.constant 0 : index
    %c0_1 = arith.constant 0 : index
    %c0_2 = arith.constant 0 : index
    %c0_3 = arith.constant 0 : index
    %0 = vector.load %arg4[%c0, %c0_0, %c0_1, %c0_2, %c0_3] : memref<1x1x20x16x128xbf16, #tpu.memory_space<vmem>>, vector<1x1x16x16x128xbf16>
    %1 = vector.shape_cast %0 : vector<1x1x16x16x128xbf16> to vector<16x16x128xbf16>
    %2 = vector.shape_cast %1 : vector<16x16x128xbf16> to vector<256x128xbf16>
    %c0_4 = arith.constant 0 : index
    %c0_5 = arith.constant 0 : index
    %c0_6 = arith.constant 0 : index
    %3 = vector.load %arg5[%c0_4, %c0_5, %c0_6] : memref<3x128x128xbf16, #tpu.memory_space<vmem>>, vector<1x128x128xbf16>
    %4 = vector.shape_cast %3 : vector<1x128x128xbf16> to vector<128x128xbf16>
    %cst = arith.constant dense<0.000000e+00> : vector<256x128xf32>
    %5 = tpu.matmul %2, %4, %cst {dimension_numbers = #tpu.dot_dimension_numbers<[1], [0], [0], [1], [0, 0, 1, 1], [], []>} : vector<256x128xbf16>, vector<128x128xbf16>, vector<256x128xf32> -> vector<256x128xf32>
    %c0_7 = arith.constant 0 : index
    %c0_8 = arith.constant 0 : index
    %c2 = arith.constant 2 : index
    %c0_9 = arith.constant 0 : index
    %c0_10 = arith.constant 0 : index
    %6 = vector.load %arg4[%c0_7, %c0_8, %c2, %c0_9, %c0_10] : memref<1x1x20x16x128xbf16, #tpu.memory_space<vmem>>, vector<1x1x16x16x128xbf16>
    %7 = vector.shape_cast %6 : vector<1x1x16x16x128xbf16> to vector<16x16x128xbf16>
    %8 = vector.shape_cast %7 : vector<16x16x128xbf16> to vector<256x128xbf16>
    %c1 = arith.constant 1 : index
    %c0_11 = arith.constant 0 : index
    %c0_12 = arith.constant 0 : index
    %9 = vector.load %arg5[%c1, %c0_11, %c0_12] : memref<3x128x128xbf16, #tpu.memory_space<vmem>>, vector<1x128x128xbf16>
    %10 = vector.shape_cast %9 : vector<1x128x128xbf16> to vector<128x128xbf16>
    %cst_13 = arith.constant dense<0.000000e+00> : vector<256x128xf32>
    %11 = tpu.matmul %8, %10, %cst_13 {dimension_numbers = #tpu.dot_dimension_numbers<[1], [0], [0], [1], [0, 0, 1, 1], [], []>} : vector<256x128xbf16>, vector<128x128xbf16>, vector<256x128xf32> -> vector<256x128xf32>
    %12 = arith.addf %5, %11 : vector<256x128xf32>
    %c0_14 = arith.constant 0 : index
    %c0_15 = arith.constant 0 : index
    %c4 = arith.constant 4 : index
    %c0_16 = arith.constant 0 : index
    %c0_17 = arith.constant 0 : index
    %13 = vector.load %arg4[%c0_14, %c0_15, %c4, %c0_16, %c0_17] : memref<1x1x20x16x128xbf16, #tpu.memory_space<vmem>>, vector<1x1x16x16x128xbf16>
    %14 = vector.shape_cast %13 : vector<1x1x16x16x128xbf16> to vector<16x16x128xbf16>
    %15 = vector.shape_cast %14 : vector<16x16x128xbf16> to vector<256x128xbf16>
    %c2_18 = arith.constant 2 : index
    %c0_19 = arith.constant 0 : index
    %c0_20 = arith.constant 0 : index
    %16 = vector.load %arg5[%c2_18, %c0_19, %c0_20] : memref<3x128x128xbf16, #tpu.memory_space<vmem>>, vector<1x128x128xbf16>
    %17 = vector.shape_cast %16 : vector<1x128x128xbf16> to vector<128x128xbf16>
    %cst_21 = arith.constant dense<0.000000e+00> : vector<256x128xf32>
    %18 = tpu.matmul %15, %17, %cst_21 {dimension_numbers = #tpu.dot_dimension_numbers<[1], [0], [0], [1], [0, 0, 1, 1], [], []>} : vector<256x128xbf16>, vector<128x128xbf16>, vector<256x128xf32> -> vector<256x128xf32>
    %19 = arith.addf %12, %18 : vector<256x128xf32>
    %c0_22 = arith.constant 0 : index
    %c0_23 = arith.constant 0 : index
    %20 = vector.load %arg6[%c0_22, %c0_23] : memref<1x128xf32, #tpu.memory_space<vmem>>, vector<1x128xf32>
    %21 = vector.shape_cast %20 : vector<1x128xf32> to vector<128xf32>
    %22 = vector.shape_cast %21 : vector<128xf32> to vector<1x128xf32>
    %23 = vector.broadcast %22 : vector<1x128xf32> to vector<256x128xf32>
    %24 = arith.mulf %19, %23 : vector<256x128xf32>
    %c0_24 = arith.constant 0 : index
    %c0_25 = arith.constant 0 : index
    %25 = vector.load %arg7[%c0_24, %c0_25] : memref<1x128xf32, #tpu.memory_space<vmem>>, vector<1x128xf32>
    %26 = vector.shape_cast %25 : vector<1x128xf32> to vector<128xf32>
    %27 = vector.shape_cast %26 : vector<128xf32> to vector<1x128xf32>
    %28 = vector.broadcast %27 : vector<1x128xf32> to vector<256x128xf32>
    %29 = arith.addf %24, %28 : vector<256x128xf32>
    %cst_26 = arith.constant 0.000000e+00 : f32
    %30 = vector.broadcast %cst_26 : f32 to vector<256x128xf32>
    %31 = arith.maximumf %29, %30 : vector<256x128xf32>
    %32 = vector.shape_cast %31 : vector<256x128xf32> to vector<16x16x128xf32>
    %c0_27 = arith.constant 0 : index
    %c0_28 = arith.constant 0 : index
    %c0_29 = arith.constant 0 : index
    %c0_30 = arith.constant 0 : index
    %33 = vector.load %arg8[%c0_27, %c0_28, %c0_29, %c0_30] : memref<1x16x16x128xf32, #tpu.memory_space<vmem>>, vector<1x16x16x128xf32>
    %34 = vector.shape_cast %33 : vector<1x16x16x128xf32> to vector<16x16x128xf32>
    %35 = vector.shape_cast %32 : vector<16x16x128xf32> to vector<1x16x16x128xf32>
    tpu.vector_store %arg8[%c0_27, %c0_28, %c0_29, %c0_30], %35 {strides = array<i32>} : memref<1x16x16x128xf32, #tpu.memory_space<vmem>>, vector<1x16x16x128xf32>,
    return
  }
  func.func @transform_0(%arg0: i32, %arg1: i32, %arg2: i32, %arg3: i32) -> (i32, i32, i32, i32, i32) {
    %c0_i32 = arith.constant 0 : i32
    %c0_i32_0 = arith.constant 0 : i32
    %c0_i32_1 = arith.constant 0 : i32
    return %arg0, %arg1, %c0_i32, %c0_i32_0, %arg3 : i32, i32, i32, i32, i32
  }
  func.func @transform_1(%arg0: i32, %arg1: i32, %arg2: i32, %arg3: i32) -> (i32, i32, i32) {
    %c0_i32 = arith.constant 0 : i32
    %c0_i32_0 = arith.constant 0 : i32
    return %c0_i32, %arg3, %arg2 : i32, i32, i32
  }
  func.func @transform_2(%arg0: i32, %arg1: i32, %arg2: i32, %arg3: i32) -> (i32, i32) {
    %c0_i32 = arith.constant 0 : i32
    %c0_i32_0 = arith.constant 0 : i32
    return %c0_i32, %arg2 : i32, i32
  }
  func.func @transform_3(%arg0: i32, %arg1: i32, %arg2: i32, %arg3: i32) -> (i32, i32) {
    %c0_i32 = arith.constant 0 : i32
    %c0_i32_0 = arith.constant 0 : i32
    return %c0_i32, %arg2 : i32, i32
  }
  func.func @transform_4(%arg0: i32, %arg1: i32, %arg2: i32, %arg3: i32) -> (i32, i32, i32, i32) {
    %c0_i32 = arith.constant 0 : i32
    %c0_i32_0 = arith.constant 0 : i32
    return %arg0, %arg1, %c0_i32, %arg2 : i32, i32, i32, i32
  }
}

</mosaic_0001>

<bundles_post_ra>
// kernel: tpu_custom_call.1
= control target key start
LH: loop header
LB: loop body
LE: loop exit
PB: predicated region body
PF: predicated region fallthrough
CT: control target
= control target key end

     0   :  { %9 = vsyncpa [#allocation3], 0  ;;  %s2918_s0 = inlined_call_operand.hbm [shape: bf16[2,1,20,16,128], index: 0, kind: input, shape index: {}]   ;;  %s2919_s1 = inlined_call_operand.hbm [shape: bf16[3,128,128], index: 1, kind: input, shape index: {}]   ;;  %s2920_s2 = inlined_call_operand.vmem [shape: f32[1,128], index: 2, kind: input, shape index: {}]   ;;  %s2921_s3 = inlined_call_operand.vmem [shape: f32[1,128], index: 3, kind: input, shape index: {}]   ;;  %s2922_s4 = inlined_call_operand.hbm [shape: f32[2,16,16,128], index: 4, kind: output, shape index: {}]  }
   0x1   :  { %11 = vsyncpa [#allocation3 + $0x1], 0 }
   0x2   :  { %12 = vsyncpa [#allocation6], 0 }
   0x3   :  { %13 = vsyncpa [#allocation4], 0 }
   0x4   :  { %15 = vsyncpa [#allocation4 + $0x1], 0  ;;  %s2479_s15 = smov 0   ;;  %s2481_s16 = smov 0  }
   0x5   :  { %s2483_s17 = smov 0   ;;  %s2485_s18 = smov 0  }
   0x6   :  { %s2487_s19 = smov 0   ;;  %s2489_s20 = smov 0  }
   0x7 LB: > { %s1698_s21 = sadd.s32 4294967295, %s2445_s20   ;;  %s1699_s22 = sadd.s32 4294967294, %s2445_s20   ;;  %s2445_s20 = sphi %s2489_s20, %s21_s20   ;;  %s2441_s19 = sphi %s2487_s19, %s2945_s19   ;;  %s2437_s18 = sphi %s2485_s18, %s2944_s18   ;;  %s2433_s17 = sphi %s2483_s17, %s2943_s17   ;;  %s2429_s16 = sphi %s2481_s16, %s2942_s16   ;;  %s2425_s15 = sphi %s2479_s15, %s2941_s15  }
   0x8   : > { %p71_p0 = scmp.ne.s32.totalorder %s2429_s16, %s2425_s15  ;;  %p2513_p1 = scmp.eq.s32.totalorder %s1698_s21, 0 }
   0x9   : > { %p2517_p2 = scmp.eq.s32.totalorder %s1698_s21, 1  ;;  %p185_p3 = scmp.eq.s32.totalorder %s1699_s22, 1 }
   0xa   : > { %s2927_s23 = scalar_select %p2513_p1, 1, 0 }
   0xb   : > { %s2928_s24 = scalar_select %p2517_p2, 1, 0 }
   0xc   : > { %p2523_p4 = por %p2513_p1, %p71_p0  ;;  %p1700_p5 = scmp.ge.s32.totalorder %s2445_s20, 1 }
   0xd   : > { %p2528_p6 = por %p185_p3, %p71_p0  ;;  %p192_p7 = scmp.lt.s32.totalorder %s2445_s20, 3 }
   0xe   : > { %s2929_s25 = scalar_select %p2523_p4, 1, 0 }
   0xf   : > { %s2930_s26 = scalar_select %p2528_p6, 1, 0 }
  0x10   : > { %p2533_p8 = pnand %p1700_p5, %p192_p7  ;;  %s2447_s28 = smov [#allocation5]  }
  0x11   : > { %s208_s29 = sshll.u32 %s2447_s28, 4  ;;  %s47_s5 = sadd.s32 1, %s2441_s19  ;;  %s209_s29 = int_to_ptr.vmem [resolvable:$true] %s208_s29 }
  0x12   : > { %s2931_s27 = scalar_select %p2533_p8, 1, 0 }
  0x13   : > { %p2160_p9 = pneg %p2533_p8  ;;  %s2301_s8 = scalar_lea.hbm %s2919_s1, 3072 }
  0x14   : > { %p2302_p12 = scmp.ne.s32.totalorder %s2919_s1, %s2301_s8  ;;  %p2308_p5 = scmp.lt.u32.totalorder %s2301_s8, %s2919_s1 }
  0x15   : > { %p2542_p11 = pnand %p2160_p9, %p2513_p1 }
  0x17   : > { %p2303_p13 = pneg %p2542_p11 }
  0x19   : > { %p2304_p0 = pnand %p2303_p13, %p2302_p12 }
  0x1b   : > { %p2305_p3 = pneg %p2304_p0 }
  0x1d   : > { %p2310_p7 = pnand %p2308_p5, %p2305_p3 }
  0x1f   : > { %2313 = shalt.err (!%p2310_p7)
}
  0x20   : > { %s2314_s13 = scalar_lea.vmem %s209_s29, 3072  ;;  %p2322_p1 = scmp.lt.s32.totalorder %s209_s29, %s209_s29 }
  0x21   : > { %p2315_p9 = scmp.ne.s32.totalorder %s209_s29, %s2314_s13  ;;  %p2323_p4 = scmp.lt.s32.totalorder %s2314_s13, %s2314_s13 }
  0x23   : > { %p2317_p10 = pnand %p2315_p9, %p2303_p13  ;;  %p2324_p8 = por %p2323_p4, %p2322_p1 }
  0x25   : > { %p2318_p6 = pneg %p2317_p10 }
  0x27   : > { %p2325_p2 = pnand %p2324_p8, %p2318_p6 }
  0x29   : > { %2328 = shalt.err (!%p2325_p2)
}
  0x2a   : > { %s2448_s14 = smov 64   ;;  %s2449_s21 = smov 4  }
  0x2b   : > { %2163 = dma.hbm_to_vmem [thread:$0]  (!%p2542_p11), %s2919_s1, 3072, %s209_s29, [#allocation6], %s2448_s14, %s2448_s14, %s2449_s21  }
  0x2c   : > { %p49_p1 = scmp.ge.s32.totalorder %s47_s5, 2  ;;  %s58_s6 = sadd.s32 1, %s2433_s17 }
  0x2d   : > { %p65_p2 = scmp.ne.s32.totalorder %s2433_s17, %s2429_s16  ;;  %p66_p4 = scmp.eq.s32.totalorder %s2445_s20, 0 }
  0x2e   : > { %s2947_s5 = smov (%p49_p1, %s47_s5), 0  ;;  %p2933_p8 = scmp.ne.s32.totalorder %s2928_s24, 0 }
  0x2f   : > { %p67_p6 = por %p66_p4, %p65_p2  ;;  %s51_s30 = ssub.s32 %s2441_s19, %s2947_s5 }
  0x30   : > { %p2574_p10 = por %p2933_p8, %p65_p2  ;;  %p2173_p12 = scmp.lt.s32.totalorder %s2445_s20, 2 }
  0x31   : > { %p56_p13 = scmp.eq.s32.totalorder %s51_s30, 0  ;;  %s234_s8 = sand.u32 1, %s2433_s17  }
  0x32   : > { %s2149_s9 = smul.u32 160, %s234_s8  ;;  %p2586_p11 = pnand %p2173_p12, %p67_p6 }
  0x33   : > { %s2583_s10 = scalar_select %p56_p13, %s2433_s17, %s58_s6  }
  0x34   : > { %s2150_s29 = smul.u32 2560, %s2441_s19  ;;  %s238_s11 = scalar_lea.vmem [#allocation2], %s2149_s9 }
  0x35   : > { %s248_s12 = sshll.u32 %s238_s11, 4  ;;  %s2597_s6 = scalar_lea.sflag [#allocation3], %s234_s8  ;;  %s2595_s12 = int_to_ptr.vmem [resolvable:$true] %s248_s12 }
  0x36   : > { %s2593_s28 = scalar_lea.hbm %s2918_s0, %s2150_s29  ;;  %p2331_p3 = pneg %p2586_p11 }
  0x37   : > { %s2329_s30 = scalar_lea.hbm %s2593_s28, 2560  ;;  %s2334_s29 = scalar_lea.hbm %s2918_s0, 5120 }
  0x38   : > { %p2330_p0 = scmp.ne.s32.totalorder %s2593_s28, %s2329_s30  ;;  %p2335_p9 = scmp.lt.u32.totalorder %s2593_s28, %s2918_s0 }
  0x39   : > { %p2336_p1 = scmp.lt.u32.totalorder %s2334_s29, %s2329_s30  ;;  %p2338_p4 = scmp.lt.u32.totalorder %s2329_s30, %s2593_s28 }
  0x3a   : > { %p2332_p5 = pnand %p2331_p3, %p2330_p0 }
  0x3b   : > { %p2337_p2 = por %p2336_p1, %p2335_p9 }
  0x3c   : > { %p2333_p7 = pneg %p2332_p5 }
  0x3d   : > { %p2339_p6 = por %p2338_p4, %p2337_p2 }
  0x3f   : > { %p2340_p8 = pnand %p2339_p6, %p2333_p7 }
  0x41   : > { %2343 = shalt.err (!%p2340_p8)
}
  0x42   : > { %s2344_s8 = scalar_lea.vmem %s2595_s12, 2560  ;;  %s2450_s9 = smov [#allocation2]  }
  0x43   : > { %p2345_p12 = scmp.ne.s32.totalorder %s2595_s12, %s2344_s8  ;;  %s2349_s11 = sshll.u32 %s2450_s9, 4  ;;  %s2350_s11 = int_to_ptr.vmem [resolvable:$false] %s2349_s11 }
  0x44   : > { %s2351_s22 = scalar_lea.vmem %s2350_s11, 5120  ;;  %p2352_p5 = scmp.lt.s32.totalorder %s2595_s12, %s2350_s11 }
  0x45   : > { %p2347_p13 = pnand %p2345_p12, %p2331_p3  ;;  %p2353_p9 = scmp.lt.s32.totalorder %s2351_s22, %s2344_s8 }
  0x47   : > { %p2348_p0 = pneg %p2347_p13  ;;  %p2354_p1 = por %p2353_p9, %p2352_p5 }
  0x49   : > { %p2355_p2 = pnand %p2354_p1, %p2348_p0 }
  0x4b   : > { %2358 = shalt.err (!%p2355_p2)
}
  0x4c   : > { %2167 = dma.hbm_to_vmem [thread:$0]  (!%p2586_p11), %s2593_s28, 2560, %s2595_s12, %s2597_s6, %s2448_s14, %s2448_s14, %s2449_s21  }
  0x4d   : > { %p2936_p3 = scmp.ne.s32.totalorder %s2931_s27, 0 }
  0x4e   : > { %s2631_s30 = sand.u32 (!%p2936_p3), 1, %s2429_s16   ;;  %p2937_p7 = scmp.ne.s32.totalorder (!%p2936_p3), %s2929_s25, 0 }
  0x4f   : > { %260 = sbr.rel (%p2936_p3) target bundleno = 450 (0x1c2), region = 36  ;;  %s263_s24 = scalar_lea.sflag (!%p2936_p3), [#allocation3], %s2631_s30 }
  0x50   : > { %s2151_s29 = smul.u32 (!%p2936_p3), 160, %s2631_s30 }
  0x52   : > { %s2635_s8 = scalar_lea.vmem (!%p2936_p3), [#allocation2], %s2151_s29 }
  0x56   : > { %2412 = dma.done.wait (%p2937_p7), %s263_s24, 2560  }
  0x57   : > { %2414 = vsyncadd (%p2937_p7), %s263_s24, 4294964736  ;;  %p2938_p11 = scmp.ne.s32.totalorder %s2927_s23, 0 }
  0x59   : > { %2416 = dma.done.wait (%p2938_p11), [#allocation6], 3072  }
  0x5a   : > { %2418 = vsyncadd (%p2938_p11), [#allocation6], 4294964224  ;;  %v2229_v0 = vld [vmem:[#allocation5 + $0x40] sm:$0xff]   ;;  %v2231_v2 = vld [vmem:[#allocation5 + $0x48] sm:$0xff]   ;;  %s1708_s21 = sshll.u32 %s2631_s30, 8  ;;  %s1852_s13 = sshll.u32 %s2437_s18, 12 }
  0x5b   : > { %v2230_v1 = vld [vmem:[#allocation5] sm:$0xff]   ;;  %1925 = vmatprep.subr.bf16.mxu1 %v2229_v0  ;;  %v2645_v3 = vld [vmem:[#allocation5 + $0x8] sm:$0xff]   ;;  %v2233_v4 = vld [vmem:[#allocation5 + $0x50] sm:$0xff]   ;;  %s2766_s12 = scalar_lea.vmem [#allocation7], %s1708_s21  ;;  %s2864_s11 = scalar_lea.hbm %s2922_s4, %s1852_s13 }
  0x5c   : > { %1973 = vmatprep.subr.bf16.mxu0 %v2230_v1  ;;  %1926 = vmatpush3.bf16.msra.mxu1 %v2229_v0  ;;  %v2648_v5 = vld [vmem:[#allocation5 + $0x10] sm:$0xff]   ;;  %v2235_v6 = vld [vmem:[#allocation5 + $0x58] sm:$0xff]   ;;  %v2237_v8 = vld [vmem:[#allocation5 + $0x60] sm:$0xff]   ;;  %s1565_s28 = sshll.u32 %s2766_s12, 4  ;;  %s1548_s18 = scalar_lea.sflag [#allocation4], %s2631_s30  ;;  %s2866_s28 = int_to_ptr.vmem [resolvable:$true] %s1565_s28 }
  0x5d   : > { %1974 = vmatpush3.bf16.msra.mxu0 %v2230_v1  ;;  %1927 = vmatprep.subr.bf16.mxu1 %v2231_v2  ;;  %v2652_v7 = vld [vmem:[#allocation5 + $0x18] sm:$0xff]   ;;  %v2656_v9 = vld [vmem:[#allocation5 + $0x20] sm:$0xff]   ;;  %v2239_v10 = vld [vmem:[#allocation5 + $0x68] sm:$0xff]   ;;  %s2359_s22 = scalar_lea.vmem %s2866_s28, 4096  ;;  %s2451_s29 = smov [#allocation7]  }
  0x5e   : > { %1975 = vmatprep.subr.bf16.mxu0 %v2645_v3  ;;  %v2658_v11 = vld [vmem:[#allocation5 + $0x28] sm:$0xff]   ;;  %v2245_v12 = vld [vmem:[%s2635_s8 + $0x10] sm:$0xff]   ;;  %v2246_v13 = vld [vmem:[%s2635_s8] sm:$0xff]   ;;  %p2360_p4 = scmp.ne.s32.totalorder %s2866_s28, %s2359_s22  ;;  %s2363_s24 = sshll.u32 %s2451_s29, 4  ;;  %s2364_s24 = int_to_ptr.vmem [resolvable:$false] %s2363_s24 }
  0x5f   : > { %1941 = vmatprep.mubr.bf16.mxu1 %v2245_v12  ;;  %1989 = vmatprep.mubr.bf16.mxu0 %v2246_v13  ;;  %v2241_v14 = vld [vmem:[#allocation5 + $0x70] sm:$0xff]   ;;  %v2243_v16 = vld [vmem:[#allocation5 + $0x78] sm:$0xff]   ;;  %v2249_v19 = vld [vmem:[#allocation5 + $0x80] sm:$0xff]   ;;  %p2366_p12 = scmp.lt.s32.totalorder %s2866_s28, %s2364_s24 }
  0x60   : > { %1928 = vmatpush3.bf16.msra.mxu1 %v2231_v2  ;;  %v2666_v15 = vld [vmem:[#allocation5 + $0x30] sm:$0xff]   ;;  %v2670_v17 = vld [vmem:[#allocation5 + $0x38] sm:$0xff]   ;;  %v2248_v20 = vld [vmem:[%s2635_s8 + $0x8] sm:$0xff]   ;;  %p2361_p6 = pnand %p2360_p4, %p2574_p10 }
  0x61   : > { %1976 = vmatpush3.bf16.msra.mxu0 %v2645_v3  ;;  %1929 = vmatprep.subr.bf16.mxu1 %v2233_v4  ;;  %v2247_v18 = vld [vmem:[%s2635_s8 + $0x18] sm:$0xff]   ;;  %v2250_v21 = vld [vmem:[#allocation5 + $0x88] sm:$0xff]   ;;  %v2251_v22 = vld [vmem:[%s2635_s8 + $0x20] sm:$0xff]  }
  0x62   : > { %1977 = vmatprep.subr.bf16.mxu0 %v2648_v5  ;;  %v2252_v23 = vld [vmem:[%s2635_s8 + $0x10] sm:$0xff]   ;;  %v2253_v24 = vld [vmem:[%s2635_s8 + $0x28] sm:$0xff]   ;;  %v2254_v26 = vld [vmem:[%s2635_s8 + $0x18] sm:$0xff]   ;;  %p2362_p8 = pneg %p2361_p6 }
  0x63   : > { %v2255_v25 = vld [vmem:[#allocation5 + $0x90] sm:$0xff]   ;;  %v2258_v28 = vld [vmem:[%s2635_s8 + $0x20] sm:$0xff]   ;;  %v2256_v29 = vld [vmem:[#allocation5 + $0x98] sm:$0xff]  }
  0x64   : > { %1930 = vmatpush3.bf16.msra.mxu1 %v2233_v4  ;;  %v2257_v27 = vld [vmem:[%s2635_s8 + $0x30] sm:$0xff]   ;;  %v2259_v30 = vld [vmem:[%s2635_s8 + $0x38] sm:$0xff]   ;;  %v2261_v31 = vld [vmem:[#allocation5 + $0xa0] sm:$0xff]  }
  0x65   : > { %1978 = vmatpush3.bf16.msra.mxu0 %v2648_v5  ;;  %1931 = vmatprep.subr.bf16.mxu1 %v2235_v6  ;;  %v2260_v32 = vld [vmem:[%s2635_s8 + $0x28] sm:$0xff]   ;;  %v2263_v33 = vld [vmem:[%s2635_s8 + $0x40] sm:$0xff]   ;;  %v2264_v34 = vld [vmem:[%s2635_s8 + $0x30] sm:$0xff]  }
  0x66   : > { %1979 = vmatprep.subr.bf16.mxu0 %v2652_v7  ;;  %v2262_v35 = vld [vmem:[#allocation5 + $0xa8] sm:$0xff]   ;;  %v2267_v37 = vld [vmem:[#allocation5 + $0xb0] sm:$0xff]   ;;  %v2266_v38 = vld [vmem:[%s2635_s8 + $0x38] sm:$0xff]  }
  0x67   : > { %v2265_v36 = vld [vmem:[%s2635_s8 + $0x48] sm:$0xff]   ;;  %v2269_v39 = vld [vmem:[%s2635_s8 + $0x50] sm:$0xff]   ;;  %v2270_v40 = vld [vmem:[%s2635_s8 + $0x20] sm:$0xff]  }
  0x68   : > { %1932 = vmatpush3.bf16.msra.mxu1 %v2235_v6  ;;  %v2268_v41 = vld [vmem:[#allocation5 + $0xb8] sm:$0xff]   ;;  %v2272_v43 = vld [vmem:[%s2635_s8 + $0x28] sm:$0xff]   ;;  %v2273_v44 = vld [vmem:[%s2635_s8 + $0x60] sm:$0xff]  }
  0x69   : > { %1980 = vmatpush3.bf16.msra.mxu0 %v2652_v7  ;;  %1933 = vmatprep.subr.bf16.mxu1 %v2237_v8  ;;  %v2271_v42 = vld [vmem:[%s2635_s8 + $0x58] sm:$0xff]   ;;  %v2274_v45 = vld [vmem:[%s2635_s8 + $0x30] sm:$0xff]   ;;  %v2275_v46 = vld [vmem:[%s2635_s8 + $0x68] sm:$0xff]  }
  0x6a   : > { %1981 = vmatprep.subr.bf16.mxu0 %v2656_v9  ;;  %v2276_v47 = vld [vmem:[%s2635_s8 + $0x38] sm:$0xff]   ;;  %v2277_v48 = vld [vmem:[%s2635_s8 + $0x70] sm:$0xff]   ;;  %v2278_v49 = vld [vmem:[%s2635_s8 + $0x40] sm:$0xff]  }
  0x6b   : > { %v2279_v50 = vld [vmem:[%s2635_s8 + $0x78] sm:$0xff]   ;;  %v2280_v51 = vld [vmem:[%s2635_s8 + $0x48] sm:$0xff]   ;;  %v2281_v52 = vld [vmem:[%s2635_s8 + $0x80] sm:$0xff]  }
  0x6c   : > { %1934 = vmatpush3.bf16.msra.mxu1 %v2237_v8  ;;  %v2282_v53 = vld [vmem:[%s2635_s8 + $0x50] sm:$0xff]   ;;  %v2283_v54 = vld [vmem:[%s2635_s8 + $0x88] sm:$0xff]   ;;  %v2284_v55 = vld [vmem:[%s2635_s8 + $0x58] sm:$0xff]  }
  0x6d   : > { %1982 = vmatpush3.bf16.msra.mxu0 %v2656_v9  ;;  %1935 = vmatprep.subr.bf16.mxu1 %v2239_v10  ;;  %v2285_v56 = vld [vmem:[%s2635_s8 + $0x40] sm:$0xff]   ;;  %v2287_v58 = vld [vmem:[%s2635_s8 + $0x48] sm:$0xff]   ;;  %v2289_v60 = vld [vmem:[%s2635_s8 + $0x50] sm:$0xff]  }
  0x6e   : > { %1983 = vmatprep.subr.bf16.mxu0 %v2658_v11  ;;  %v2286_v57 = vld [vmem:[%s2635_s8 + $0x60] sm:$0xff]   ;;  %v2288_v59 = vld [vmem:[%s2635_s8 + $0x68] sm:$0xff]   ;;  %v2290_v61 = vld [vmem:[%s2635_s8 + $0x70] sm:$0xff]  }
  0x6f   : > { %v2291_v62 = vld [vmem:[%s2635_s8 + $0x58] sm:$0xff]   ;;  %v2293_v0 = vld [vmem:[%s2635_s8 + $0x60] sm:$0xff]   ;;  %v2295_v2 = vld [vmem:[%s2635_s8 + $0x68] sm:$0xff]  }
  0x70   : > { %1936 = vmatpush3.bf16.msra.mxu1 %v2239_v10  ;;  %v2292_v63 = vld [vmem:[%s2635_s8 + $0x78] sm:$0xff]   ;;  %v2297_v4 = vld [vmem:[%s2635_s8 + $0x70] sm:$0xff]  }
  0x71   : > { %1984 = vmatpush3.bf16.msra.mxu0 %v2658_v11  ;;  %1937 = vmatprep.subr.bf16.mxu1 %v2241_v14  ;;  %v2299_v6 = vld [vmem:[%s2635_s8 + $0x78] sm:$0xff]  }
  0x72   : > { %1985 = vmatprep.subr.bf16.mxu0 %v2666_v15 }
  0x74   : > { %1938 = vmatpush3.bf16.msra.mxu1 %v2241_v14 }
  0x75   : > { %1986 = vmatpush3.bf16.msra.mxu0 %v2666_v15  ;;  %1939 = vmatprep.subr.bf16.mxu1 %v2243_v16 }
  0x76   : > { %1987 = vmatprep.subr.bf16.mxu0 %v2670_v17 }
  0x78   : > { %1940 = vmatpush3.bf16.msra.mxu1 %v2243_v16 }
  0x79   : > { %1988 = vmatpush3.bf16.msra.mxu0 %v2670_v17  ;;  %2069 = vmatprep.subr.bf16.mxu1 %v2230_v1 }
  0x7a   : > { %2021 = vmatprep.subr.bf16.mxu0 %v2249_v19 }
  0x7b   : > { %1942 = vmatmul.mubr.bf16.vlgmr.msra.gmra.mrb[0].mxu1 %v2247_v18 }
  0x7c   : > { %1990 = vmatmul.mubr.bf16.vlgmr.msra.gmra.mrb[0].mxu0 %v2248_v20  ;;  %2077 = vmatpush3.bf16.msra.mxu1 %v2230_v1  ;;  %v2294_v1 = vld [vmem:[%s2635_s8 + $0x80] sm:$0xff]  }
  0x7d   : > { %2022 = vmatpush3.bf16.msra.mxu0 %v2249_v19  ;;  %1945 = vmatprep.mubr.bf16.mxu1 %v2251_v22 }
  0x7e   : > { %2023 = vmatprep.subr.bf16.mxu0 %v2250_v21  ;;  %1993 = vmatprep.mubr.bf16.mxu0 %v2252_v23 }
  0x7f   : > { %2070 = vmatprep.subr.bf16.mxu1 %v2645_v3 }
  0x80   : > { %2078 = vmatpush3.bf16.msra.mxu1 %v2645_v3  ;;  %v2296_v3 = vld [vmem:[%s2635_s8 + $0x88] sm:$0xff]  }
  0x81   : > { %2024 = vmatpush3.bf16.msra.mxu0 %v2250_v21  ;;  %2071 = vmatprep.subr.bf16.mxu1 %v2648_v5 }
  0x82   : > { %2025 = vmatprep.subr.bf16.mxu0 %v2255_v25 }
  0x83   : > { %1946 = vmatmul.mubr.bf16.gmra.mrb[4].mxu1 %v2253_v24 }
  0x84   : > { %1994 = vmatmul.mubr.bf16.gmra.mrb[4].mxu0 %v2254_v26  ;;  %1949 = vmatprep.mubr.bf16.mxu1 %v2257_v27 }
  0x85   : > { %2026 = vmatpush3.bf16.msra.mxu0 %v2255_v25  ;;  %1997 = vmatprep.mubr.bf16.mxu0 %v2258_v28  ;;  %v2750_v25 = vld [vmem:[%s2920_s2] ss:$0 sm:$0xff] }
  0x86   : > { %2027 = vmatprep.subr.bf16.mxu0 %v2256_v29  ;;  %2079 = vmatpush3.bf16.msra.mxu1 %v2648_v5  ;;  %v2298_v5 = vld [vmem:[%s2635_s8 + $0x90] sm:$0xff]   ;;  %v2755_v28 = vld [vmem:[%s2921_s3] ss:$0 sm:$0xff] }
  0x87   : > { %2072 = vmatprep.subr.bf16.mxu1 %v2652_v7 }
  0x89   : > { %2028 = vmatpush3.bf16.msra.mxu0 %v2256_v29 }
  0x8a   : > { %2029 = vmatprep.subr.bf16.mxu0 %v2261_v31  ;;  %2080 = vmatpush3.bf16.msra.mxu1 %v2652_v7  ;;  %v2300_v7 = vld [vmem:[%s2635_s8 + $0x98] sm:$0xff]   ;;  %s2365_s8 = scalar_lea.vmem %s2364_s24, 8192 }
  0x8b   : > { %1950 = vmatmul.mubr.bf16.gmra.mrb[8].mxu1 %v2259_v30  ;;  %2073 = vmatprep.subr.bf16.mxu1 %v2656_v9  ;;  %p2367_p13 = scmp.lt.s32.totalorder %s2365_s8, %s2359_s22 }
  0x8c   : > { %1998 = vmatmul.mubr.bf16.gmra.mrb[8].mxu0 %v2260_v32  ;;  %1953 = vmatprep.mubr.bf16.mxu1 %v2263_v33 }
  0x8d   : > { %2030 = vmatpush3.bf16.msra.mxu0 %v2261_v31  ;;  %2001 = vmatprep.mubr.bf16.mxu0 %v2264_v34  ;;  %p2368_p0 = por %p2367_p13, %p2366_p12 }
  0x8e   : > { %2031 = vmatprep.subr.bf16.mxu0 %v2262_v35  ;;  %2081 = vmatpush3.bf16.msra.mxu1 %v2656_v9 }
  0x8f   : > { %2074 = vmatprep.subr.bf16.mxu1 %v2658_v11  ;;  %p2369_p5 = pnand %p2368_p0, %p2362_p8 }
  0x91   : > { %2032 = vmatpush3.bf16.msra.mxu0 %v2262_v35 }
  0x92   : > { %2033 = vmatprep.subr.bf16.mxu0 %v2267_v37  ;;  %2082 = vmatpush3.bf16.msra.mxu1 %v2658_v11 }
  0x93   : > { %1954 = vmatmul.mubr.bf16.gmra.mrb[12].mxu1 %v2265_v36  ;;  %2075 = vmatprep.subr.bf16.mxu1 %v2666_v15 }
  0x94   : > { %2002 = vmatmul.mubr.bf16.gmra.mrb[12].mxu0 %v2266_v38  ;;  %1957 = vmatprep.mubr.bf16.mxu1 %v2269_v39 }
  0x95   : > { %2034 = vmatpush3.bf16.msra.mxu0 %v2267_v37  ;;  %2037 = vmatprep.mubr.bf16.mxu0 %v2270_v40 }
  0x96   : > { %2035 = vmatprep.subr.bf16.mxu0 %v2268_v41  ;;  %2083 = vmatpush3.bf16.msra.mxu1 %v2666_v15 }
  0x97   : > { %2076 = vmatprep.subr.bf16.mxu1 %v2670_v17 }
  0x99   : > { %2036 = vmatpush3.bf16.msra.mxu0 %v2268_v41 }
  0x9a   : > { %2084 = vmatpush3.bf16.msra.mxu1 %v2670_v17 }
  0x9b   : > { %1958 = vmatmul.mubr.bf16.gmra.mrb[16].mxu1 %v2271_v42 }
  0x9c   : > { %2038 = vmatmul.mubr.bf16.vlgmr.msra.gmra.mrb[0].mxu0 %v2272_v43  ;;  %1961 = vmatprep.mubr.bf16.mxu1 %v2273_v44 }
  0x9d   : > { %2041 = vmatprep.mubr.bf16.mxu0 %v2274_v45 }
  0xa3   : > { %1962 = vmatmul.mubr.bf16.gmra.mrb[20].mxu1 %v2275_v46 }
  0xa4   : > { %2042 = vmatmul.mubr.bf16.gmra.mrb[4].mxu0 %v2276_v47  ;;  %1965 = vmatprep.mubr.bf16.mxu1 %v2277_v48 }
  0xa5   : > { %2045 = vmatprep.mubr.bf16.mxu0 %v2278_v49 }
  0xab   : > { %1966 = vmatmul.mubr.bf16.gmra.mrb[24].mxu1 %v2279_v50 }
  0xac   : > { %2046 = vmatmul.mubr.bf16.gmra.mrb[8].mxu0 %v2280_v51  ;;  %1969 = vmatprep.mubr.bf16.mxu1 %v2281_v52 }
  0xad   : > { %2049 = vmatprep.mubr.bf16.mxu0 %v2282_v53 }
  0xb3   : > { %1970 = vmatmul.mubr.bf16.gmra.mrb[28].mxu1 %v2283_v54 }
  0xb4   : > { %2050 = vmatmul.mubr.bf16.gmra.mrb[12].mxu0 %v2284_v55  ;;  %2005 = vmatprep.mubr.bf16.mxu1 %v2285_v56 }
  0xb5   : > { %2053 = vmatprep.mubr.bf16.mxu0 %v2286_v57 }
  0xbb   : > { %2006 = vmatmul.mubr.bf16.vlgmr.msra.gmra.mrb[16].mxu1 %v2287_v58 }
  0xbc   : > { %2054 = vmatmul.mubr.bf16.gmra.mrb[16].mxu0 %v2288_v59  ;;  %2009 = vmatprep.mubr.bf16.mxu1 %v2289_v60 }
  0xbd   : > { %2057 = vmatprep.mubr.bf16.mxu0 %v2290_v61 }
  0xc3   : > { %2010 = vmatmul.mubr.bf16.gmra.mrb[20].mxu1 %v2291_v62 }
  0xc4   : > { %2058 = vmatmul.mubr.bf16.gmra.mrb[20].mxu0 %v2292_v63  ;;  %2013 = vmatprep.mubr.bf16.mxu1 %v2293_v0 }
  0xc5   : > { %2061 = vmatprep.mubr.bf16.mxu0 %v2294_v1 }
  0xcb   : > { %2014 = vmatmul.mubr.bf16.gmra.mrb[24].mxu1 %v2295_v2 }
  0xcc   : > { %2062 = vmatmul.mubr.bf16.gmra.mrb[24].mxu0 %v2296_v3  ;;  %2017 = vmatprep.mubr.bf16.mxu1 %v2297_v4 }
  0xcd   : > { %2065 = vmatprep.mubr.bf16.mxu0 %v2298_v5 }
  0xd3   : > { %2018 = vmatmul.mubr.bf16.gmra.mrb[28].mxu1 %v2299_v6 }
  0xd4   : > { %2066 = vmatmul.mubr.bf16.gmra.mrb[28].mxu0 %v2300_v7 }
 0x14e   : > { %v1943_v8 = vpop.f32.mrb[0].mxu1 }
 0x14f   : > { %v586_v9 = vpop.f32.mrb[1].mxu1 }
 0x150   : > { %v1944_v10 = vpop.f32.mrb[2].mxu1 }
 0x151   : > { %v589_v11 = vpop.f32.mrb[3].mxu1 }
 0x156   : > { %v1947_v12 = vpop.f32.mrb[4].mxu1 }
 0x157   : > { %v602_v13 = vpop.f32.mrb[5].mxu1 }
 0x158   : > { %v1948_v14 = vpop.f32.mrb[6].mxu1 }
 0x159   : > { %v605_v15 = vpop.f32.mrb[7].mxu1 }
 0x15e   : > { %v1951_v16 = vpop.f32.mrb[8].mxu1 }
 0x15f   : > { %v618_v17 = vpop.f32.mrb[9].mxu1 }
 0x160   : > { %v2735_v18 = vpop.f32.mrb[10].mxu1 }
 0x161   : > { %v2737_v19 = vpop.f32.mrb[11].mxu1 }
 0x166   : > { %v2739_v20 = vpop.f32.mrb[12].mxu1 }
 0x167   : > { %v2741_v21 = vpop.f32.mrb[13].mxu1 }
 0x168   : > { %v2743_v22 = vpop.f32.mrb[14].mxu1 }
 0x169   : > { %v2745_v23 = vpop.f32.mrb[15].mxu1 }
 0x16f   : > { %v2039_v24 = vpop.f32.mrb[0].mxu0 }
 0x170   : > { %v2085_v26 = vadd.f32 %v2039_v24, %v1943_v8  ;;  %v1246_v27 = vpop.f32.mrb[1].mxu0 }
 0x171   : > { %v2086_v29 = vadd.f32 %v1246_v27, %v586_v9  ;;  %v2040_v30 = vpop.f32.mrb[2].mxu0 }
 0x172   : > { %v1414_v31 = vmul.f32 %v2085_v26, %v2750_v25  ;;  %v2087_v32 = vadd.f32 %v2040_v30, %v1944_v10  ;;  %v1249_v33 = vpop.f32.mrb[3].mxu0 }
 0x173   : > { %v1412_v34 = vmul.f32 %v2086_v29, %v2750_v25  ;;  %v2088_v35 = vadd.f32 %v1249_v33, %v589_v11 }
 0x174   : > { %v1453_v36 = vadd.f32 %v2755_v28, %v1414_v31  ;;  %v1415_v37 = vmul.f32 %v2087_v32, %v2750_v25 }
 0x175   : > { %v1451_v38 = vadd.f32 %v2755_v28, %v1412_v34  ;;  %v1413_v39 = vmul.f32 %v2088_v35, %v2750_v25 }
 0x176   : > { %v1485_v40 = vmax.f32 %v1453_v36, 0.0  ;;  %v1454_v41 = vadd.f32 %v2755_v28, %v1415_v37 }
 0x177   : > { %v1483_v42 = vmax.f32 %v1451_v38, 0.0  ;;  %v1452_v43 = vadd.f32 %v2755_v28, %v1413_v39  ;;  %v2043_v44 = vpop.f32.mrb[4].mxu0 }
 0x178   : > { %1517 = vst [vmem:[%s2766_s12 + $0x10] sm:$0xff] %v1485_v40  ;;  %v1486_v45 = vmax.f32 %v1454_v41, 0.0  ;;  %v2089_v46 = vadd.f32 %v2043_v44, %v1947_v12  ;;  %v1262_v47 = vpop.f32.mrb[5].mxu0 }
 0x179   : > { %1515 = vst [vmem:[%s2766_s12] sm:$0xff] %v1483_v42  ;;  %v1484_v48 = vmax.f32 %v1452_v43, 0.0  ;;  %v2090_v49 = vadd.f32 %v1262_v47, %v602_v13  ;;  %v2044_v50 = vpop.f32.mrb[6].mxu0 }
 0x17a   : > { %1518 = vst [vmem:[%s2766_s12 + $0x18] sm:$0xff] %v1486_v45  ;;  %v1418_v51 = vmul.f32 %v2089_v46, %v2750_v25  ;;  %v2091_v52 = vadd.f32 %v2044_v50, %v1948_v14  ;;  %v1265_v53 = vpop.f32.mrb[7].mxu0 }
 0x17b   : > { %1516 = vst [vmem:[%s2766_s12 + $0x8] sm:$0xff] %v1484_v48  ;;  %v1416_v54 = vmul.f32 %v2090_v49, %v2750_v25  ;;  %v2092_v55 = vadd.f32 %v1265_v53, %v605_v15 }
 0x17c   : > { %v1457_v56 = vadd.f32 %v2755_v28, %v1418_v51  ;;  %v1419_v57 = vmul.f32 %v2091_v52, %v2750_v25 }
 0x17d   : > { %v1455_v58 = vadd.f32 %v2755_v28, %v1416_v54  ;;  %v1417_v59 = vmul.f32 %v2092_v55, %v2750_v25 }
 0x17e   : > { %v1489_v60 = vmax.f32 %v1457_v56, 0.0  ;;  %v1458_v61 = vadd.f32 %v2755_v28, %v1419_v57 }
 0x17f   : > { %v1487_v62 = vmax.f32 %v1455_v58, 0.0  ;;  %v1456_v63 = vadd.f32 %v2755_v28, %v1417_v59  ;;  %v2047_v0 = vpop.f32.mrb[8].mxu0 }
 0x180   : > { %1521 = vst [vmem:[%s2766_s12 + $0x30] sm:$0xff] %v1489_v60  ;;  %v1490_v1 = vmax.f32 %v1458_v61, 0.0  ;;  %v2093_v2 = vadd.f32 %v2047_v0, %v1951_v16  ;;  %v1278_v3 = vpop.f32.mrb[9].mxu0 }
 0x181   : > { %1519 = vst [vmem:[%s2766_s12 + $0x20] sm:$0xff] %v1487_v62  ;;  %v1488_v4 = vmax.f32 %v1456_v63, 0.0  ;;  %v2094_v5 = vadd.f32 %v1278_v3, %v618_v17  ;;  %v2048_v6 = vpop.f32.mrb[10].mxu0 }
 0x182   : > { %1522 = vst [vmem:[%s2766_s12 + $0x38] sm:$0xff] %v1490_v1  ;;  %v1422_v7 = vmul.f32 %v2093_v2, %v2750_v25  ;;  %v2095_v8 = vadd.f32 %v2048_v6, %v2735_v18  ;;  %v1281_v9 = vpop.f32.mrb[11].mxu0 }
 0x183   : > { %1520 = vst [vmem:[%s2766_s12 + $0x28] sm:$0xff] %v1488_v4  ;;  %v1420_v10 = vmul.f32 %v2094_v5, %v2750_v25  ;;  %v2096_v11 = vadd.f32 %v1281_v9, %v2737_v19 }
 0x184   : > { %v1461_v12 = vadd.f32 %v2755_v28, %v1422_v7  ;;  %v1423_v13 = vmul.f32 %v2095_v8, %v2750_v25 }
 0x185   : > { %v1459_v14 = vadd.f32 %v2755_v28, %v1420_v10  ;;  %v1421_v15 = vmul.f32 %v2096_v11, %v2750_v25 }
 0x186   : > { %v1493_v16 = vmax.f32 %v1461_v12, 0.0  ;;  %v1462_v17 = vadd.f32 %v2755_v28, %v1423_v13 }
 0x187   : > { %v1491_v18 = vmax.f32 %v1459_v14, 0.0  ;;  %v1460_v24 = vadd.f32 %v2755_v28, %v1421_v15  ;;  %v2051_v26 = vpop.f32.mrb[12].mxu0 }
 0x188   : > { %1525 = vst [vmem:[%s2766_s12 + $0x50] sm:$0xff] %v1493_v16  ;;  %v1494_v27 = vmax.f32 %v1462_v17, 0.0  ;;  %v2097_v19 = vadd.f32 %v2051_v26, %v2739_v20  ;;  %v1294_v29 = vpop.f32.mrb[13].mxu0 }
 0x189   : > { %1523 = vst [vmem:[%s2766_s12 + $0x40] sm:$0xff] %v1491_v18  ;;  %v1492_v30 = vmax.f32 %v1460_v24, 0.0  ;;  %v2098_v31 = vadd.f32 %v1294_v29, %v2741_v21  ;;  %v2052_v32 = vpop.f32.mrb[14].mxu0 }
 0x18a   : > { %1526 = vst [vmem:[%s2766_s12 + $0x58] sm:$0xff] %v1494_v27  ;;  %v1426_v33 = vmul.f32 %v2097_v19, %v2750_v25  ;;  %v2099_v34 = vadd.f32 %v2052_v32, %v2743_v22  ;;  %v1297_v35 = vpop.f32.mrb[15].mxu0 }
 0x18b   : > { %1524 = vst [vmem:[%s2766_s12 + $0x48] sm:$0xff] %v1492_v30  ;;  %v1424_v36 = vmul.f32 %v2098_v31, %v2750_v25  ;;  %v2100_v37 = vadd.f32 %v1297_v35, %v2745_v23 }
 0x18c   : > { %v1465_v20 = vadd.f32 %v2755_v28, %v1426_v33  ;;  %v1427_v38 = vmul.f32 %v2099_v34, %v2750_v25 }
 0x18d   : > { %v1463_v21 = vadd.f32 %v2755_v28, %v1424_v36  ;;  %v1425_v39 = vmul.f32 %v2100_v37, %v2750_v25 }
 0x18e   : > { %v1497_v40 = vmax.f32 %v1465_v20, 0.0  ;;  %v1466_v41 = vadd.f32 %v2755_v28, %v1427_v38  ;;  %v2007_v22 = vpop.f32.mrb[16].mxu1 }
 0x18f   : > { %v1495_v42 = vmax.f32 %v1463_v21, 0.0  ;;  %v1464_v43 = vadd.f32 %v2755_v28, %v1425_v39  ;;  %v2055_v44 = vpop.f32.mrb[16].mxu0  ;;  %v955_v23 = vpop.f32.mrb[17].mxu1 }
 0x190   : > { %1529 = vst [vmem:[%s2766_s12 + $0x70] sm:$0xff] %v1497_v40  ;;  %v1498_v45 = vmax.f32 %v1466_v41, 0.0  ;;  %v2101_v46 = vadd.f32 %v2055_v44, %v2007_v22  ;;  %v1310_v47 = vpop.f32.mrb[17].mxu0  ;;  %v2008_v48 = vpop.f32.mrb[18].mxu1 }
 0x191   : > { %1527 = vst [vmem:[%s2766_s12 + $0x60] sm:$0xff] %v1495_v42  ;;  %v1496_v49 = vmax.f32 %v1464_v43, 0.0  ;;  %v2102_v50 = vadd.f32 %v1310_v47, %v955_v23  ;;  %v2056_v51 = vpop.f32.mrb[18].mxu0  ;;  %v958_v52 = vpop.f32.mrb[19].mxu1 }
 0x192   : > { %1530 = vst [vmem:[%s2766_s12 + $0x78] sm:$0xff] %v1498_v45  ;;  %v1430_v53 = vmul.f32 %v2101_v46, %v2750_v25  ;;  %v2103_v54 = vadd.f32 %v2056_v51, %v2008_v48  ;;  %v1313_v55 = vpop.f32.mrb[19].mxu0 }
 0x193   : > { %1528 = vst [vmem:[%s2766_s12 + $0x68] sm:$0xff] %v1496_v49  ;;  %v1428_v56 = vmul.f32 %v2102_v50, %v2750_v25  ;;  %v2104_v57 = vadd.f32 %v1313_v55, %v958_v52 }
 0x194   : > { %v1469_v58 = vadd.f32 %v2755_v28, %v1430_v53  ;;  %v1431_v59 = vmul.f32 %v2103_v54, %v2750_v25 }
 0x195   : > { %v1467_v60 = vadd.f32 %v2755_v28, %v1428_v56  ;;  %v1429_v61 = vmul.f32 %v2104_v57, %v2750_v25 }
 0x196   : > { %v1501_v62 = vmax.f32 %v1469_v58, 0.0  ;;  %v1470_v63 = vadd.f32 %v2755_v28, %v1431_v59  ;;  %v2011_v0 = vpop.f32.mrb[20].mxu1 }
 0x197   : > { %v1499_v1 = vmax.f32 %v1467_v60, 0.0  ;;  %v1468_v2 = vadd.f32 %v2755_v28, %v1429_v61  ;;  %v2059_v3 = vpop.f32.mrb[20].mxu0  ;;  %v971_v4 = vpop.f32.mrb[21].mxu1 }
 0x198   : > { %1533 = vst [vmem:[%s2766_s12 + $0x90] sm:$0xff] %v1501_v62  ;;  %v1502_v5 = vmax.f32 %v1470_v63, 0.0  ;;  %v2105_v6 = vadd.f32 %v2059_v3, %v2011_v0  ;;  %v1326_v7 = vpop.f32.mrb[21].mxu0  ;;  %v2012_v8 = vpop.f32.mrb[22].mxu1 }
 0x199   : > { %1531 = vst [vmem:[%s2766_s12 + $0x80] sm:$0xff] %v1499_v1  ;;  %v1500_v9 = vmax.f32 %v1468_v2, 0.0  ;;  %v2106_v10 = vadd.f32 %v1326_v7, %v971_v4  ;;  %v2060_v11 = vpop.f32.mrb[22].mxu0  ;;  %v974_v12 = vpop.f32.mrb[23].mxu1 }
 0x19a   : > { %1534 = vst [vmem:[%s2766_s12 + $0x98] sm:$0xff] %v1502_v5  ;;  %v1434_v13 = vmul.f32 %v2105_v6, %v2750_v25  ;;  %v2107_v14 = vadd.f32 %v2060_v11, %v2012_v8  ;;  %v1329_v15 = vpop.f32.mrb[23].mxu0 }
 0x19b   : > { %1532 = vst [vmem:[%s2766_s12 + $0x88] sm:$0xff] %v1500_v9  ;;  %v1432_v16 = vmul.f32 %v2106_v10, %v2750_v25  ;;  %v2108_v17 = vadd.f32 %v1329_v15, %v974_v12 }
 0x19c   : > { %v1473_v18 = vadd.f32 %v2755_v28, %v1434_v13  ;;  %v1435_v24 = vmul.f32 %v2107_v14, %v2750_v25 }
 0x19d   : > { %v1471_v26 = vadd.f32 %v2755_v28, %v1432_v16  ;;  %v1433_v27 = vmul.f32 %v2108_v17, %v2750_v25 }
 0x19e   : > { %v1505_v19 = vmax.f32 %v1473_v18, 0.0  ;;  %v1474_v29 = vadd.f32 %v2755_v28, %v1435_v24  ;;  %v2015_v30 = vpop.f32.mrb[24].mxu1 }
 0x19f   : > { %v1503_v31 = vmax.f32 %v1471_v26, 0.0  ;;  %v1472_v32 = vadd.f32 %v2755_v28, %v1433_v27  ;;  %v2063_v33 = vpop.f32.mrb[24].mxu0  ;;  %v987_v34 = vpop.f32.mrb[25].mxu1 }
 0x1a0   : > { %1537 = vst [vmem:[%s2766_s12 + $0xb0] sm:$0xff] %v1505_v19  ;;  %v1506_v35 = vmax.f32 %v1474_v29, 0.0  ;;  %v2109_v36 = vadd.f32 %v2063_v33, %v2015_v30  ;;  %v1342_v37 = vpop.f32.mrb[25].mxu0  ;;  %v2016_v20 = vpop.f32.mrb[26].mxu1 }
 0x1a1   : > { %1535 = vst [vmem:[%s2766_s12 + $0xa0] sm:$0xff] %v1503_v31  ;;  %v1504_v38 = vmax.f32 %v1472_v32, 0.0  ;;  %v2110_v21 = vadd.f32 %v1342_v37, %v987_v34  ;;  %v2064_v39 = vpop.f32.mrb[26].mxu0  ;;  %v990_v40 = vpop.f32.mrb[27].mxu1 }
 0x1a2   : > { %1538 = vst [vmem:[%s2766_s12 + $0xb8] sm:$0xff] %v1506_v35  ;;  %v1438_v41 = vmul.f32 %v2109_v36, %v2750_v25  ;;  %v2111_v22 = vadd.f32 %v2064_v39, %v2016_v20  ;;  %v1345_v42 = vpop.f32.mrb[27].mxu0 }
 0x1a3   : > { %1536 = vst [vmem:[%s2766_s12 + $0xa8] sm:$0xff] %v1504_v38  ;;  %v1436_v43 = vmul.f32 %v2110_v21, %v2750_v25  ;;  %v2112_v44 = vadd.f32 %v1345_v42, %v990_v40 }
 0x1a4   : > { %v1477_v23 = vadd.f32 %v2755_v28, %v1438_v41  ;;  %v1439_v45 = vmul.f32 %v2111_v22, %v2750_v25 }
 0x1a5   : > { %v1475_v46 = vadd.f32 %v2755_v28, %v1436_v43  ;;  %v1437_v47 = vmul.f32 %v2112_v44, %v2750_v25 }
 0x1a6   : > { %v1509_v48 = vmax.f32 %v1477_v23, 0.0  ;;  %v1478_v49 = vadd.f32 %v2755_v28, %v1439_v45  ;;  %v2019_v50 = vpop.f32.mrb[28].mxu1 }
 0x1a7   : > { %v1507_v51 = vmax.f32 %v1475_v46, 0.0  ;;  %v1476_v52 = vadd.f32 %v2755_v28, %v1437_v47  ;;  %v2067_v53 = vpop.f32.mrb[28].mxu0  ;;  %v1003_v54 = vpop.f32.mrb[29].mxu1 }
 0x1a8   : > { %1541 = vst [vmem:[%s2766_s12 + $0xd0] sm:$0xff] %v1509_v48  ;;  %v1510_v55 = vmax.f32 %v1478_v49, 0.0  ;;  %v2113_v56 = vadd.f32 %v2067_v53, %v2019_v50  ;;  %v1358_v57 = vpop.f32.mrb[29].mxu0  ;;  %v2020_v58 = vpop.f32.mrb[30].mxu1 }
 0x1a9   : > { %1539 = vst [vmem:[%s2766_s12 + $0xc0] sm:$0xff] %v1507_v51  ;;  %v1508_v59 = vmax.f32 %v1476_v52, 0.0  ;;  %v2114_v60 = vadd.f32 %v1358_v57, %v1003_v54  ;;  %v2068_v61 = vpop.f32.mrb[30].mxu0  ;;  %v1006_v62 = vpop.f32.mrb[31].mxu1 }
 0x1aa   : > { %1542 = vst [vmem:[%s2766_s12 + $0xd8] sm:$0xff] %v1510_v55  ;;  %v1442_v63 = vmul.f32 %v2113_v56, %v2750_v25  ;;  %v2115_v0 = vadd.f32 %v2068_v61, %v2020_v58  ;;  %v1361_v1 = vpop.f32.mrb[31].mxu0 }
 0x1ab   : > { %1540 = vst [vmem:[%s2766_s12 + $0xc8] sm:$0xff] %v1508_v59  ;;  %v1440_v2 = vmul.f32 %v2114_v60, %v2750_v25  ;;  %v2116_v3 = vadd.f32 %v1361_v1, %v1006_v62 }
 0x1ac   : > { %v1481_v4 = vadd.f32 %v2755_v28, %v1442_v63  ;;  %v1443_v5 = vmul.f32 %v2115_v0, %v2750_v25 }
 0x1ad   : > { %v1479_v6 = vadd.f32 %v2755_v28, %v1440_v2  ;;  %v1441_v7 = vmul.f32 %v2116_v3, %v2750_v25 }
 0x1ae   : > { %v1513_v8 = vmax.f32 %v1481_v4, 0.0  ;;  %v1482_v9 = vadd.f32 %v2755_v28, %v1443_v5 }
 0x1af   : > { %v1511_v10 = vmax.f32 %v1479_v6, 0.0  ;;  %v1480_v11 = vadd.f32 %v2755_v28, %v1441_v7 }
 0x1b0   : > { %1545 = vst [vmem:[%s2766_s12 + $0xf0] sm:$0xff] %v1513_v8  ;;  %v1514_v12 = vmax.f32 %v1482_v9, 0.0 }
 0x1b1   : > { %1543 = vst [vmem:[%s2766_s12 + $0xe0] sm:$0xff] %v1511_v10  ;;  %v1512_v25 = vmax.f32 %v1480_v11, 0.0 }
 0x1b2   : > { %1546 = vst [vmem:[%s2766_s12 + $0xf8] sm:$0xff] %v1514_v12 }
 0x1b3   : > { %1544 = vst [vmem:[%s2766_s12 + $0xe8] sm:$0xff] %v1512_v25 }
 0x1b4   : > { %2372 = shalt.err (!%p2369_p5)
}
 0x1b5   : > { %s2373_s23 = scalar_lea.hbm %s2864_s11, 4096  ;;  %s2377_s14 = scalar_lea.hbm %s2922_s4, 8192 }
 0x1b6   : > { %p2374_p9 = scmp.ne.s32.totalorder %s2864_s11, %s2373_s23  ;;  %p2378_p3 = scmp.lt.u32.totalorder %s2864_s11, %s2922_s4 }
 0x1b7   : > { %p2379_p7 = scmp.lt.u32.totalorder %s2377_s14, %s2373_s23  ;;  %p2381_p4 = scmp.lt.u32.totalorder %s2373_s23, %s2864_s11 }
 0x1b8   : > { %p2375_p1 = pnand %p2374_p9, %p2574_p10 }
 0x1b9   : > { %p2380_p11 = por %p2379_p7, %p2378_p3 }
 0x1ba   : > { %p2376_p2 = pneg %p2375_p1 }
 0x1bb   : > { %p2382_p6 = por %p2381_p4, %p2380_p11 }
 0x1bd   : > { %p2383_p8 = pnand %p2382_p6, %p2376_p2 }
 0x1bf   : > { %2386 = shalt.err (!%p2383_p8)
}
 0x1c0   : > { %s2452_s13 = smov 128   ;;  %s2453_s6 = smov 8  }
 0x1c1   : > { %2158 = dma.vmem_to_hbm [thread:$0]  (%p2574_p10), %s2866_s28, 4096, %s2864_s11, %s1548_s18, %s2452_s13, %s2452_s13, %s2453_s6  }
 0x1c2 PF: > { %s1580_s9 = sand.u32 1, %s2425_s15   ;;  %p2939_p12 = scmp.ne.s32.totalorder %s2930_s26, 0 }
 0x1c3   : > { %p2940_p13 = scmp.ge.s32.totalorder %s2445_s20, 2  ;;  %s1581_s22 = scalar_lea.sflag [#allocation4], %s1580_s9 }
 0x1c5   : > { %p2169_p0 = pnand %p2940_p13, %p2939_p12 }
 0x1c7   : > { %2420 = dma.done.wait (!%p2169_p0), %s1581_s22, 4096  }
 0x1c8   : > { %2422 = vsyncadd (!%p2169_p0), %s1581_s22, 4294963200  ;;  %s21_s20 = sadd.s32 1, %s2445_s20   ;;  %s2941_s15 = smov %s2429_s16 }
 0x1c9   : > { %p18_p5 = scmp.ge.s32.totalorder %s21_s20, 4   ;;  %s2942_s16 = smov %s2433_s17 }
 0x1ca   : > { %s2943_s17 = smov %s2583_s10  ;;  %s2944_s18 = smov %s2441_s19 }
 0x1cb   : > { %s2945_s19 = smov %s2947_s5  ;;  %20 = sbr.rel (!%p18_p5) target bundleno = 7 (0x7), region = 96 }
 0x1d2   :  { %1586 = vsyncpa [#allocation3], 1 }
 0x1d3   :  { %1588 = vsyncpa [#allocation3 + $0x1], 1 }
 0x1d4   :  { %1589 = vsyncpa [#allocation6], 1 }
 0x1d5   :  { %1590 = vsyncpa [#allocation4], 1 }
 0x1d6   :  { %1592 = vsyncpa [#allocation4 + $0x1], 1 }

</bundles_post_ra>
